<compile_context>
chip_gen: v7x
topology: tpu7x:2x2x1
jax: 0.10.0
libtpu: 0.0.40
codegen_flags: <defaults>
</compile_context>

<pallas_src>
import jax
import jax.numpy as jnp
from jax.experimental import pallas as pl
from jax.experimental.pallas import tpu as pltpu

MAX_VQA_LENGTH = 20


# ----------------------------------------------------------------------------
# Pass 1: Linear(H->2H) -> GeLU -> LayerNorm (normalized only)  +  cls head
# ----------------------------------------------------------------------------
def _prefix_kernel(
    x_ref,      # (TM, H)    pooled LXRT feature                 bf16
    c_ref,      # (TM, C)    LSTMCNN classifier feature          bf16
    w1_ref,     # (H, 2H)    logit_fc[0] weight                  bf16
    b1_ref,     # (1, 2H)    logit_fc[0] bias                    f32
    wc_ref,     # (C, Lp)    cls_fc[1] weight (lane-padded)      bf16
    bc_ref,     # (1, Lp)    cls_fc[1] bias                      f32
    t_ref,      # (TM, 2H)   normalized activation -> output 0   bf16
    cls_ref,    # (TM, Lp)   question-type logits  -> output 1   f32
):
    # Linear(H -> 2H)
    t = jnp.dot(x_ref[...], w1_ref[...], preferred_element_type=jnp.float32) + b1_ref[...]
    # GeLU (exact erf form, matching lxmert's GeLU module)
    t = t * 0.5 * (1.0 + jax.lax.erf(t * jnp.float32(0.7071067811865476)))
    # BertLayerNorm(2H, eps=1e-12), biased variance, single-pass statistics.
    # gamma/beta are folded into w2/b2 offline, so only the normalized t is stored.
    mu = jnp.mean(t, axis=-1, keepdims=True)
    ms = jnp.mean(t * t, axis=-1, keepdims=True)
    var = jnp.maximum(ms - mu * mu, 0.0)
    t_ref[...] = ((t - mu) * jax.lax.rsqrt(var + jnp.float32(1e-12))).astype(t_ref.dtype)

    # cls_fc: ReLU -> Linear(C -> num_labels)   (ReLU commutes with the bf16 cast)
    c = jnp.maximum(c_ref[...], 0)
    cls = jnp.dot(c, wc_ref[...], preferred_element_type=jnp.float32) + bc_ref[...]
    cls_ref[...] = cls.astype(cls_ref.dtype)


# ----------------------------------------------------------------------------
# Pass 2: answer head  t_norm @ w2' + b2'  (gamma/beta already folded in)
# ----------------------------------------------------------------------------
def _answer_kernel(
    t_ref,      # (TM, 2H)   normalized activation               bf16
    w2_ref,     # (2H, TN)   folded logit_fc[3] weight tile      bf16
    b2_ref,     # (1, TN)    folded logit_fc[3] bias tile        f32
    o_ref,      # (TM, TN)   VQA logits tile                     f32
):
    o = jnp.dot(t_ref[...], w2_ref[...], preferred_element_type=jnp.float32) + b2_ref[...]
    o_ref[...] = o.astype(o_ref.dtype)


# ----------------------------------------------------------------------------
# Host-side helpers
# ----------------------------------------------------------------------------
def _round_up(n, m):
    return ((n + m - 1) // m) * m


def _pick_answer_tile(a_pad, cap=2048):
    """Largest multiple of 128 that divides a_pad and is <= cap (128 always works)."""
    k = max(1, min(cap, a_pad) // 128)
    while k > 1 and a_pad % (k * 128) != 0:
        k -= 1
    return k * 128


def prepare_params(p, lane=128):
    """Cast matmul weights to bf16, lane-pad output dims, fold LayerNorm affine
    into the answer head:  (t*gamma + beta) @ w2 + b2 == t @ (gamma[:,None]*w2) + (beta@w2 + b2)."""
    a_pad = _round_up(p["w2"].shape[1], lane)
    l_pad = _round_up(p["wc"].shape[1], lane)

    def pad_cols(a, n):
        return jnp.pad(a, ((0, 0), (0, n - a.shape[1])))

    w2f = p["gamma"].reshape(-1, 1) * p["w2"]          # (2H, A)
    b2f = p["b2"] + p["beta"] @ p["w2"]                # (1, A)

    return {
        "w1": p["w1"].astype(jnp.bfloat16),
        "b1": p["b1"].astype(jnp.float32),
        "w2": pad_cols(w2f, a_pad).astype(jnp.bfloat16),
        "b2": pad_cols(b2f, a_pad).astype(jnp.float32),
        "wc": pad_cols(p["wc"], l_pad).astype(jnp.bfloat16),
        "bc": pad_cols(p["bc"], l_pad).astype(jnp.float32),
    }


def lstmcnn_fusion_before_cross_head(x, cls_out, kp, num_answers, num_labels,
                                     *, batch_tile=None, answer_tile=None):
    """x: (B, H) pooled LXRT output.  cls_out: (B, C) LSTMCNN classifier feature."""
    B, H = x.shape
    C = cls_out.shape[1]
    H2 = kp["w1"].shape[1]
    A_pad = kp["w2"].shape[1]
    L_pad = kp["wc"].shape[1]

    # --- batch tiling (cap 256 to fill the 256-row MXU on v6e/v7x; pass
    #     batch_tile=128 on v5e if desired).  Arbitrary B handled by zero-padding.
    if batch_tile is not None:
        TM = batch_tile
    elif B <= 256:
        TM = _round_up(B, 8)
    else:
        TM = 256
    B_pad = _round_up(B, TM)
    ni = B_pad // TM

    # --- answer tiling: TN must divide A_pad (fixes the TN=512 / A_pad=3200 crash).
    TN = answer_tile or _pick_answer_tile(A_pad)
    assert A_pad % TN == 0 and TN % 128 == 0
    nj = A_pad // TN

    # bf16 activations on the host (halves activation HBM DMA; ReLU is sign-preserving).
    x16 = x.astype(jnp.bfloat16)
    c16 = cls_out.astype(jnp.bfloat16)
    if B_pad != B:
        x16 = jnp.pad(x16, ((0, B_pad - B), (0, 0)))
        c16 = jnp.pad(c16, ((0, B_pad - B), (0, 0)))

    row1 = lambda i: (i, 0)
    const1 = lambda i: (0, 0)

    # --- Pass 1: prefix + cls head -------------------------------------------
    vmem1 = int(min(
        2 * (TM * H * 2 + TM * C * 2 + H * H2 * 2 + H2 * 4
             + C * L_pad * 2 + L_pad * 4 + TM * H2 * 2 + TM * L_pad * 4)
        + (8 << 20),
        48 << 20))
    cost1 = pl.CostEstimate(
        flops=2 * B_pad * (H * H2 + C * L_pad),
        transcendentals=B_pad * H2,
        bytes_accessed=int(x16.nbytes + c16.nbytes
                           + kp["w1"].nbytes + kp["b1"].nbytes
                           + kp["wc"].nbytes + kp["bc"].nbytes
                           + B_pad * H2 * 2 + B_pad * L_pad * 4),
    )
    t_norm, cls_pad = pl.pallas_call(
        _prefix_kernel,
        out_shape=(jax.ShapeDtypeStruct((B_pad, H2), jnp.bfloat16),
                   jax.ShapeDtypeStruct((B_pad, L_pad), jnp.float32)),
        grid=(ni,),
        in_specs=[
            pl.BlockSpec((TM, H), row1),       # x            (batch tile)
            pl.BlockSpec((TM, C), row1),       # cls_out      (batch tile)
            pl.BlockSpec((H, H2), const1),     # w1           (VMEM-resident)
            pl.BlockSpec((1, H2), const1),     # b1
            pl.BlockSpec((C, L_pad), const1),  # wc           (VMEM-resident)
            pl.BlockSpec((1, L_pad), const1),  # bc
        ],
        out_specs=(pl.BlockSpec((TM, H2), row1),
                   pl.BlockSpec((TM, L_pad), row1)),
        compiler_params=pltpu.CompilerParams(
            dimension_semantics=("parallel",),
            vmem_limit_bytes=vmem1,
        ),
        cost_estimate=cost1,
    )(x16, c16, kp["w1"], kp["b1"], kp["wc"], kp["bc"])

    # --- Pass 2: streamed answer-head matmul ----------------------------------
    # Grid = (answer tiles, batch tiles): answer axis OUTER so the w2 tile stays
    # VMEM-resident across batch tiles; both axes are independent ("parallel"),
    # so on v7x the dominant matmul shards over both TensorCores.
    vmem2 = int(min(
        2 * (TM * H2 * 2 + H2 * TN * 2 + TN * 4 + TM * TN * 4) + (8 << 20),
        48 << 20))
    cost2 = pl.CostEstimate(
        flops=2 * B_pad * H2 * A_pad,
        transcendentals=0,
        bytes_accessed=int(nj * B_pad * H2 * 2 + kp["w2"].nbytes
                           + kp["b2"].nbytes + B_pad * A_pad * 4),
    )
    logit_pad = pl.pallas_call(
        _answer_kernel,
        out_shape=jax.ShapeDtypeStruct((B_pad, A_pad), jnp.float32),
        grid=(nj, ni),
        in_specs=[
            pl.BlockSpec((TM, H2), lambda j, i: (i, 0)),   # t      (batch tile)
            pl.BlockSpec((H2, TN), lambda j, i: (0, j)),   # w2     (answer tile, outer-resident)
            pl.BlockSpec((1, TN), lambda j, i: (0, j)),    # b2
        ],
        out_specs=pl.BlockSpec((TM, TN), lambda j, i: (i, j)),   # lane-dense slab
        compiler_params=pltpu.CompilerParams(
            dimension_semantics=("parallel", "parallel"),
            vmem_limit_bytes=vmem2,
        ),
        cost_estimate=cost2,
    )(t_norm, kp["w2"], kp["b2"])

    # Slice real batch rows and unpadded answer / question-type columns outside.
    return logit_pad[:B, :num_answers], cls_pad[:B, :num_labels]


# ----------------------------------------------------------------------------
# Deterministic parameter init (BERT-style: normal(0, 0.02), zero biases)
# ----------------------------------------------------------------------------
def init_params(key, hid_dim, cls_dim, num_answers, num_labels=5):
    ks = jax.random.split(key, 3)
    std = 0.02
    return {
        "w1": std * jax.random.normal(ks[0], (hid_dim, 2 * hid_dim), jnp.float32),
        "b1": jnp.zeros((1, 2 * hid_dim), jnp.float32),
        "gamma": jnp.ones((1, 2 * hid_dim), jnp.float32),
        "beta": jnp.zeros((1, 2 * hid_dim), jnp.float32),
        "w2": std * jax.random.normal(ks[1], (2 * hid_dim, num_answers), jnp.float32),
        "b2": jnp.zeros((1, num_answers), jnp.float32),
        "wc": std * jax.random.normal(ks[2], (cls_dim, num_labels), jnp.float32),
        "bc": jnp.zeros((1, num_labels), jnp.float32),
    }


# Pure-f32 JAX reference for a correctness check.
def reference_head(x, cls_out, p):
    t = x @ p["w1"] + p["b1"]
    t = t * 0.5 * (1.0 + jax.lax.erf(t / jnp.sqrt(2.0)))
    mu = jnp.mean(t, -1, keepdims=True)
    var = jnp.mean((t - mu) ** 2, -1, keepdims=True)
    t = (t - mu) / jnp.sqrt(var + 1e-12)
    t = t * p["gamma"] + p["beta"]
    logit = t @ p["w2"] + p["b2"]
    cls_logits = jnp.maximum(cls_out, 0.0) @ p["wc"] + p["bc"]
    return logit, cls_logits


if __name__ == "__main__":
    # Small shapes: batch=8, hidden=128 (stand-in for BERT/LSTMCNN's 768),
    # num question-type labels=5 (as in the module).
    B, H, C = 8, 128, 128
    NUM_LABELS = 5
    OBJ, VFEAT = 36, 64

    key = jax.random.PRNGKey(0)
    k_feat, k_pos, k_x, k_c, k_p1, k_p2 = jax.random.split(key, 6)

    # Inputs of the original forward (item, feat, pos, sent).  feat/pos/sent and
    # item['visual'/'question'/'q_length'] feed the pretrained LXRT encoder and
    # the LSTMCNN classifier, which are not translatable to a Pallas kernel;
    # their outputs are synthesized below.
    feat = jax.random.normal(k_feat, (B, OBJ, VFEAT), jnp.float32)   # (b, o, f)
    pos = jax.random.uniform(k_pos, (B, OBJ, 4), jnp.float32)        # (b, o, 4)
    # TODO(synk): LXRT cross-modality encoder lxrt_encoder(q_rep, sent, (feat, pos))
    # is a pretrained transformer stack -- its pooled output x is synthesized.
    x = jax.random.normal(k_x, (B, H), jnp.float32)
    # TODO(synk): LSTMCNNModel(v, q, q_length) -> (cls_out, q) is a pretrained
    # LSTM/CNN stack (plus the q.repeat(1, 20, 1) fusion fed back into the LXRT
    # encoder) -- its cls_out feature is synthesized.
    cls_out = jax.random.normal(k_c, (B, C), jnp.float32)

    # --- check 1: small answer vocab (single answer tile) ---------------------
    NUM_ANSWERS = 16
    params_f32 = init_params(k_p1, H, C, NUM_ANSWERS, NUM_LABELS)
    kparams = prepare_params(params_f32)
    logit, cls_logits = lstmcnn_fusion_before_cross_head(
        x, cls_out, kparams, NUM_ANSWERS, NUM_LABELS)
    jax.block_until_ready((logit, cls_logits))
    ref_logit, ref_cls = reference_head(x, cls_out, params_f32)
    assert logit.shape == (B, NUM_ANSWERS) and cls_logits.shape == (B, NUM_LABELS)
    # bf16 matmul weights/activations (f32 accumulate) -> looser tolerance vs f32 ref.
    assert jnp.allclose(logit, ref_logit, atol=2e-2, rtol=2e-2)
    assert jnp.allclose(cls_logits, ref_cls, atol=2e-2, rtol=2e-2)

    # --- check 2: production-style answer vocab (3129 -> A_pad=3200, TN=640) --
    # Exercises the multi-answer-tile path that crashed in v1.
    NUM_ANSWERS2 = 3129
    params2_f32 = init_params(k_p2, H, C, NUM_ANSWERS2, NUM_LABELS)
    kparams2 = prepare_params(params2_f32)
    logit2, cls_logits2 = lstmcnn_fusion_before_cross_head(
        x, cls_out, kparams2, NUM_ANSWERS2, NUM_LABELS)
    jax.block_until_ready((logit2, cls_logits2))
    ref_logit2, ref_cls2 = reference_head(x, cls_out, params2_f32)
    assert logit2.shape == (B, NUM_ANSWERS2) and cls_logits2.shape == (B, NUM_LABELS)
    assert jnp.allclose(logit2, ref_logit2, atol=2e-2, rtol=2e-2)
    assert jnp.allclose(cls_logits2, ref_cls2, atol=2e-2, rtol=2e-2)

    print("KERNEL_OK")
</pallas_src>

<mosaic_0001>
module attributes {stable_mosaic.version = 11 : i64} {
  func.func @_prefix_kernel(%arg0: i32, %arg1: memref<8x128xbf16, #tpu.memory_space<vmem>>, %arg2: memref<8x128xbf16, #tpu.memory_space<vmem>>, %arg3: memref<128x256xbf16, #tpu.memory_space<vmem>>, %arg4: memref<1x256xf32, #tpu.memory_space<vmem>>, %arg5: memref<128x128xbf16, #tpu.memory_space<vmem>>, %arg6: memref<1x128xf32, #tpu.memory_space<vmem>>, %arg7: memref<8x256xbf16, #tpu.memory_space<vmem>>, %arg8: memref<8x128xf32, #tpu.memory_space<vmem>>) attributes {dimension_semantics = [#tpu.dimension_semantics<parallel>], iteration_bounds = array<i64: 1>, scalar_prefetch = 0 : i64, scratch_operands = 0 : i64, tpu.core_type = #tpu.core_type<tc>, window_params = [{transform_indices = @transform_0, window_bounds = array<i64: 8, 128>}, {transform_indices = @transform_1, window_bounds = array<i64: 8, 128>}, {pipeline_mode = #tpu.pipeline_mode<synchronous>, transform_indices = @transform_2, window_bounds = array<i64: 128, 256>}, {pipeline_mode = #tpu.pipeline_mode<synchronous>, transform_indices = @transform_3, window_bounds = array<i64: 1, 256>}, {pipeline_mode = #tpu.pipeline_mode<synchronous>, transform_indices = @transform_4, window_bounds = array<i64: 128, 128>}, {pipeline_mode = #tpu.pipeline_mode<synchronous>, transform_indices = @transform_5, window_bounds = array<i64: 1, 128>}, {transform_indices = @transform_6, window_bounds = array<i64: 8, 256>}, {transform_indices = @transform_7, window_bounds = array<i64: 8, 128>}]} {
    %c0 = arith.constant 0 : index
    %c0_0 = arith.constant 0 : index
    %0 = vector.load %arg1[%c0, %c0_0] : memref<8x128xbf16, #tpu.memory_space<vmem>>, vector<8x128xbf16>
    %c0_1 = arith.constant 0 : index
    %c0_2 = arith.constant 0 : index
    %1 = vector.load %arg3[%c0_1, %c0_2] : memref<128x256xbf16, #tpu.memory_space<vmem>>, vector<128x256xbf16>
    %cst = arith.constant dense<0.000000e+00> : vector<8x256xf32>
    %2 = tpu.matmul %0, %1, %cst {dimension_numbers = #tpu.dot_dimension_numbers<[1], [0], [0], [1], [0, 0, 1, 1], [], []>} : vector<8x128xbf16>, vector<128x256xbf16>, vector<8x256xf32> -> vector<8x256xf32>
    %c0_3 = arith.constant 0 : index
    %c0_4 = arith.constant 0 : index
    %3 = vector.load %arg4[%c0_3, %c0_4] : memref<1x256xf32, #tpu.memory_space<vmem>>, vector<1x256xf32>
    %4 = vector.broadcast %3 : vector<1x256xf32> to vector<8x256xf32>
    %5 = arith.addf %2, %4 : vector<8x256xf32>
    %cst_5 = arith.constant 5.000000e-01 : f32
    %6 = vector.broadcast %cst_5 : f32 to vector<8x256xf32>
    %7 = arith.mulf %5, %6 : vector<8x256xf32>
    %cst_6 = arith.constant 0.707106769 : f32
    %8 = vector.broadcast %cst_6 : f32 to vector<8x256xf32>
    %9 = arith.mulf %5, %8 : vector<8x256xf32>
    %10 = math.erf %9 : vector<8x256xf32>
    %cst_7 = arith.constant 1.000000e+00 : f32
    %11 = vector.broadcast %cst_7 : f32 to vector<8x256xf32>
    %12 = arith.addf %11, %10 : vector<8x256xf32>
    %13 = arith.mulf %7, %12 : vector<8x256xf32>
    %cst_8 = arith.constant dense<0.000000e+00> : vector<8xf32>
    %14 = vector.multi_reduction <add>, %13, %cst_8 [1] : vector<8x256xf32> to vector<8xf32>
    %15 = vector.shape_cast %14 : vector<8xf32> to vector<8x1xf32>
    %cst_9 = arith.constant 2.560000e+02 : f32
    %16 = vector.broadcast %cst_9 : f32 to vector<8x1xf32>
    %17 = arith.divf %15, %16 : vector<8x1xf32>
    %18 = arith.mulf %13, %13 : vector<8x256xf32>
    %cst_10 = arith.constant dense<0.000000e+00> : vector<8xf32>
    %19 = vector.multi_reduction <add>, %18, %cst_10 [1] : vector<8x256xf32> to vector<8xf32>
    %20 = vector.shape_cast %19 : vector<8xf32> to vector<8x1xf32>
    %cst_11 = arith.constant 2.560000e+02 : f32
    %21 = vector.broadcast %cst_11 : f32 to vector<8x1xf32>
    %22 = arith.divf %20, %21 : vector<8x1xf32>
    %23 = arith.mulf %17, %17 : vector<8x1xf32>
    %24 = arith.subf %22, %23 : vector<8x1xf32>
    %cst_12 = arith.constant 0.000000e+00 : f32
    %25 = vector.broadcast %cst_12 : f32 to vector<8x1xf32>
    %26 = arith.maximumf %24, %25 : vector<8x1xf32>
    %27 = vector.broadcast %17 : vector<8x1xf32> to vector<8x256xf32>
    %28 = arith.subf %13, %27 : vector<8x256xf32>
    %cst_13 = arith.constant 9.99999996E-13 : f32
    %29 = vector.broadcast %cst_13 : f32 to vector<8x1xf32>
    %30 = arith.addf %26, %29 : vector<8x1xf32>
    %31 = math.rsqrt %30 : vector<8x1xf32>
    %32 = vector.broadcast %31 : vector<8x1xf32> to vector<8x256xf32>
    %33 = arith.mulf %28, %32 : vector<8x256xf32>
    %34 = arith.truncf %33 : vector<8x256xf32> to vector<8x256xbf16>
    %c0_14 = arith.constant 0 : index
    %c0_15 = arith.constant 0 : index
    %35 = vector.load %arg7[%c0_14, %c0_15] : memref<8x256xbf16, #tpu.memory_space<vmem>>, vector<8x256xbf16>
    tpu.vector_store %arg7[%c0_14, %c0_15], %34 {strides = array<i32>} : memref<8x256xbf16, #tpu.memory_space<vmem>>, vector<8x256xbf16>,
    %c0_16 = arith.constant 0 : index
    %c0_17 = arith.constant 0 : index
    %36 = vector.load %arg2[%c0_16, %c0_17] : memref<8x128xbf16, #tpu.memory_space<vmem>>, vector<8x128xbf16>
    %cst_18 = arith.constant 0.000000e+00 : bf16
    %37 = vector.broadcast %cst_18 : bf16 to vector<8x128xbf16>
    %38 = arith.maximumf %36, %37 : vector<8x128xbf16>
    %c0_19 = arith.constant 0 : index
    %c0_20 = arith.constant 0 : index
    %39 = vector.load %arg5[%c0_19, %c0_20] : memref<128x128xbf16, #tpu.memory_space<vmem>>, vector<128x128xbf16>
    %cst_21 = arith.constant dense<0.000000e+00> : vector<8x128xf32>
    %40 = tpu.matmul %38, %39, %cst_21 {dimension_numbers = #tpu.dot_dimension_numbers<[1], [0], [0], [1], [0, 0, 1, 1], [], []>} : vector<8x128xbf16>, vector<128x128xbf16>, vector<8x128xf32> -> vector<8x128xf32>
    %c0_22 = arith.constant 0 : index
    %c0_23 = arith.constant 0 : index
    %41 = vector.load %arg6[%c0_22, %c0_23] : memref<1x128xf32, #tpu.memory_space<vmem>>, vector<1x128xf32>
    %42 = vector.broadcast %41 : vector<1x128xf32> to vector<8x128xf32>
    %43 = arith.addf %40, %42 : vector<8x128xf32>
    %c0_24 = arith.constant 0 : index
    %c0_25 = arith.constant 0 : index
    %44 = vector.load %arg8[%c0_24, %c0_25] : memref<8x128xf32, #tpu.memory_space<vmem>>, vector<8x128xf32>
    tpu.vector_store %arg8[%c0_24, %c0_25], %43 {strides = array<i32>} : memref<8x128xf32, #tpu.memory_space<vmem>>, vector<8x128xf32>,
    return
  }
  func.func @transform_0(%arg0: i32) -> (i32, i32) {
    %c0_i32 = arith.constant 0 : i32
    %c0_i32_0 = arith.constant 0 : i32
    return %arg0, %c0_i32 : i32, i32
  }
  func.func @transform_1(%arg0: i32) -> (i32, i32) {
    %c0_i32 = arith.constant 0 : i32
    %c0_i32_0 = arith.constant 0 : i32
    return %arg0, %c0_i32 : i32, i32
  }
  func.func @transform_2(%arg0: i32) -> (i32, i32) {
    %c0_i32 = arith.constant 0 : i32
    %c0_i32_0 = arith.constant 0 : i32
    %c0_i32_1 = arith.constant 0 : i32
    return %c0_i32, %c0_i32_0 : i32, i32
  }
  func.func @transform_3(%arg0: i32) -> (i32, i32) {
    %c0_i32 = arith.constant 0 : i32
    %c0_i32_0 = arith.constant 0 : i32
    %c0_i32_1 = arith.constant 0 : i32
    return %c0_i32, %c0_i32_0 : i32, i32
  }
  func.func @transform_4(%arg0: i32) -> (i32, i32) {
    %c0_i32 = arith.constant 0 : i32
    %c0_i32_0 = arith.constant 0 : i32
    %c0_i32_1 = arith.constant 0 : i32
    return %c0_i32, %c0_i32_0 : i32, i32
  }
  func.func @transform_5(%arg0: i32) -> (i32, i32) {
    %c0_i32 = arith.constant 0 : i32
    %c0_i32_0 = arith.constant 0 : i32
    %c0_i32_1 = arith.constant 0 : i32
    return %c0_i32, %c0_i32_0 : i32, i32
  }
  func.func @transform_6(%arg0: i32) -> (i32, i32) {
    %c0_i32 = arith.constant 0 : i32
    %c0_i32_0 = arith.constant 0 : i32
    return %arg0, %c0_i32 : i32, i32
  }
  func.func @transform_7(%arg0: i32) -> (i32, i32) {
    %c0_i32 = arith.constant 0 : i32
    %c0_i32_0 = arith.constant 0 : i32
    return %arg0, %c0_i32 : i32, i32
  }
}

</mosaic_0001>

<bundles_post_ra>
// kernel: tpu_custom_call.1
= control target key start
LH: loop header
LB: loop body
LE: loop exit
PB: predicated region body
PF: predicated region fallthrough
CT: control target
= control target key end

     0   :  { %13 = vsyncpa [#allocation3], 0  ;;  %s795_s0 = inlined_call_operand.hbm [shape: bf16[8,128], index: 0, kind: input, shape index: {}]   ;;  %s796_s1 = inlined_call_operand.hbm [shape: bf16[8,128], index: 1, kind: input, shape index: {}]   ;;  %s797_s2 = inlined_call_operand.hbm [shape: bf16[128,256], index: 2, kind: input, shape index: {}]   ;;  %s798_s3 = inlined_call_operand.vmem [shape: f32[1,256], index: 3, kind: input, shape index: {}]   ;;  %s799_s4 = inlined_call_operand.hbm [shape: bf16[128,128], index: 4, kind: input, shape index: {}]   ;;  %s800_s5 = inlined_call_operand.vmem [shape: f32[1,128], index: 5, kind: input, shape index: {}]   ;;  %s801_s6 = inlined_call_operand.hbm [shape: bf16[8,256], index: 6, kind: output, shape index: {0}]   ;;  %s802_s7 = inlined_call_operand.hbm [shape: f32[8,128], index: 7, kind: output, shape index: {1}]  }
   0x1   :  { %14 = vsyncpa [#allocation6], 0 }
   0x2   :  { %15 = vsyncpa [#allocation9], 0 }
   0x3   :  { %16 = vsyncpa [#allocation4], 0 }
   0x4   :  { %17 = vsyncpa [#allocation12], 0  ;;  %s662_s24 = smov [#allocation5]   ;;  %s663_s26 = smov [#allocation2]  }
   0x5   :  { %s34_s25 = sshll.u32 %s662_s24, 4  ;;  %s24_s27 = sshll.u32 %s663_s26, 4  ;;  %s35_s25 = int_to_ptr.vmem [resolvable:$true] %s34_s25  ;;  %s25_s27 = int_to_ptr.vmem [resolvable:$true] %s24_s27 }
   0x6   :  { %s520_s30 = scalar_lea.hbm %s796_s1, 64 }
   0x7   :  { %p521_p0 = scmp.ne.s32.totalorder %s796_s1, %s520_s30  ;;  %p524_p1 = scmp.lt.u32.totalorder %s520_s30, %s796_s1 }
   0x9   :  { %p526_p2 = pnand %p524_p1, %p521_p0 }
   0xb   :  { %529 = shalt.err (!%p526_p2)
}
   0xc   :  { %s530_s12 = scalar_lea.vmem %s35_s25, 64  ;;  %p535_p4 = scmp.lt.s32.totalorder %s35_s25, %s35_s25 }
   0xd   :  { %p531_p3 = scmp.ne.s32.totalorder %s35_s25, %s530_s12  ;;  %p536_p5 = scmp.lt.s32.totalorder %s530_s12, %s530_s12 }
   0xf   :  { %p537_p6 = por %p536_p5, %p535_p4 }
  0x11   :  { %p538_p7 = pnand %p537_p6, %p531_p3 }
  0x13   :  { %541 = shalt.err (!%p538_p7)
}
  0x14   :  { %37 = dma.hbm_to_vmem [thread:$0]  %s796_s1, 64, %s35_s25, [#allocation6]  }
  0x15   :  { %s542_s17 = scalar_lea.hbm %s795_s0, 64 }
  0x16   :  { %p543_p8 = scmp.ne.s32.totalorder %s795_s0, %s542_s17  ;;  %p546_p9 = scmp.lt.u32.totalorder %s542_s17, %s795_s0 }
  0x18   :  { %p548_p10 = pnand %p546_p9, %p543_p8 }
  0x1a   :  { %551 = shalt.err (!%p548_p10)
}
  0x1b   :  { %s552_s22 = scalar_lea.vmem %s25_s27, 64  ;;  %p557_p12 = scmp.lt.s32.totalorder %s25_s27, %s25_s27 }
  0x1c   :  { %p553_p11 = scmp.ne.s32.totalorder %s25_s27, %s552_s22  ;;  %p558_p13 = scmp.lt.s32.totalorder %s552_s22, %s552_s22 }
  0x1e   :  { %p559_p0 = por %p558_p13, %p557_p12 }
  0x20   :  { %p560_p1 = pnand %p559_p0, %p553_p11 }
  0x22   :  { %563 = shalt.err (!%p560_p1)
}
  0x23   :  { %27 = dma.hbm_to_vmem [thread:$0]  %s795_s0, 64, %s25_s27, [#allocation3]  }
  0x24   :  { %s664_s24 = smov [#allocation7]   ;;  %s564_s29 = scalar_lea.hbm %s797_s2, 2048 }
  0x25   :  { %s43_s25 = sshll.u32 %s664_s24, 4  ;;  %p565_p2 = scmp.ne.s32.totalorder %s797_s2, %s564_s29  ;;  %s44_s25 = int_to_ptr.vmem [resolvable:$true] %s43_s25 }
  0x26   :  { %p568_p3 = scmp.lt.u32.totalorder %s564_s29, %s797_s2 }
  0x28   :  { %p570_p4 = pnand %p568_p3, %p565_p2 }
  0x2a   :  { %573 = shalt.err (!%p570_p4)
}
  0x2b   :  { %s574_s11 = scalar_lea.vmem %s44_s25, 2048  ;;  %p579_p6 = scmp.lt.s32.totalorder %s44_s25, %s44_s25 }
  0x2c   :  { %p575_p5 = scmp.ne.s32.totalorder %s44_s25, %s574_s11  ;;  %p580_p7 = scmp.lt.s32.totalorder %s574_s11, %s574_s11 }
  0x2e   :  { %p581_p8 = por %p580_p7, %p579_p6 }
  0x30   :  { %p582_p9 = pnand %p581_p8, %p575_p5 }
  0x32   :  { %585 = shalt.err (!%p582_p9)
}
  0x33   :  { %s665_s0 = smov 128   ;;  %s666_s27 = smov 8  }
  0x34   :  { %49 = dma.hbm_to_vmem [thread:$0]  %s797_s2, 2048, %s44_s25, [#allocation6], %s665_s0, %s665_s0, %s666_s27  }
  0x35   :  { %s667_s14 = smov [#allocation8]   ;;  %s586_s18 = scalar_lea.hbm %s799_s4, 1024 }
  0x36   :  { %s57_s15 = sshll.u32 %s667_s14, 4  ;;  %p587_p10 = scmp.ne.s32.totalorder %s799_s4, %s586_s18  ;;  %s58_s15 = int_to_ptr.vmem [resolvable:$true] %s57_s15 }
  0x37   :  { %p590_p11 = scmp.lt.u32.totalorder %s586_s18, %s799_s4 }
  0x39   :  { %p592_p12 = pnand %p590_p11, %p587_p10 }
  0x3b   :  { %595 = shalt.err (!%p592_p12)
}
  0x3c   :  { %s596_s1 = scalar_lea.vmem %s58_s15, 1024  ;;  %p601_p0 = scmp.lt.s32.totalorder %s58_s15, %s58_s15 }
  0x3d   :  { %p597_p13 = scmp.ne.s32.totalorder %s58_s15, %s596_s1  ;;  %p602_p1 = scmp.lt.s32.totalorder %s596_s1, %s596_s1 }
  0x3f   :  { %p603_p2 = por %p602_p1, %p601_p0 }
  0x41   :  { %p604_p3 = pnand %p603_p2, %p597_p13 }
  0x43   :  { %607 = shalt.err (!%p604_p3)
}
  0x44   :  { %s668_s2 = smov 64   ;;  %s669_s23 = smov 4  }
  0x45   :  { %63 = dma.hbm_to_vmem [thread:$0]  %s799_s4, 1024, %s58_s15, [#allocation9], %s668_s2, %s668_s2, %s669_s23  }
  0x46   :  { %652 = dma.done.wait [#allocation3], 64  }
  0x47   :  { %653 = vsyncadd [#allocation3], 4294967232 }
  0x48   :  { %654 = dma.done.wait [#allocation6], 2112  }
  0x49   :  { %655 = vsyncadd [#allocation6], 4294965184 }
  0x4a   :  { %656 = dma.done.wait [#allocation9], 1024  }
  0x4b   :  { %657 = vsyncadd [#allocation9], 4294966272  ;;  %v670_v0 = vmov 0   ;;  %v671_v1 = vmov 0.0   ;;  %vm672_vm0 = vmmov 0   ;;  %v506_v11 = vld [vmem:[#allocation8] sm:$0xff]   ;;  %v98_v29 = vlaneseq }
  0x4c   :  { %220 = vmatprep.mubr.bf16.mxu0 %v670_v0  ;;  %449 = vmatprep.subr.bf16.mxu1 %v671_v1  ;;  %v482_v2 = vld [vmem:[#allocation7 + $0x4] ss:$8 sps:$4 sm:$0xff]   ;;  %v484_v3 = vld [vmem:[#allocation7] ss:$8 sps:$4 sm:$0xff]   ;;  %v485_v4 = vld [vmem:[#allocation7 + $0x14] ss:$8 sps:$4 sm:$0xff]  }
  0x4d   :  { %465 = vmatprep.mubr.msk.bf16.mxu1 %vm672_vm0, %v671_v1  ;;  %188 = vmatprep.subr.bf16.mxu0 %v482_v2  ;;  %v487_v5 = vld [vmem:[#allocation7 + $0x10] ss:$8 sps:$4 sm:$0xff]   ;;  %v488_v6 = vld [vmem:[#allocation7 + $0x24] ss:$8 sps:$4 sm:$0xff]   ;;  %v490_v7 = vld [vmem:[#allocation7 + $0x20] ss:$8 sps:$4 sm:$0xff]  }
  0x4e   :  { %189 = vmatpush1.bf16.msra.mxu0 %v484_v3  ;;  %v491_v8 = vld [vmem:[#allocation7 + $0x34] ss:$8 sps:$4 sm:$0xff]   ;;  %v493_v9 = vld [vmem:[#allocation7 + $0x30] ss:$8 sps:$4 sm:$0xff]   ;;  %v494_v10 = vld [vmem:[#allocation7 + $0x44] ss:$8 sps:$4 sm:$0xff]   ;;  %450 = vmatpush3.bf16.msra.mxu1 %v506_v11 }
  0x4f   :  { %190 = vmatprep.subr.bf16.mxu0 %v485_v4  ;;  %v507_v12 = vld [vmem:[#allocation8 + $0x8] sm:$0xff]   ;;  %451 = vmatprep.subr.bf16.mxu1 %v671_v1  ;;  %v497_v14 = vld [vmem:[#allocation7 + $0x54] ss:$8 sps:$4 sm:$0xff]   ;;  %v499_v16 = vld [vmem:[#allocation7 + $0x50] ss:$8 sps:$4 sm:$0xff]   ;;  %v99_v30 = vshrl.u32 %v98_v29, 7 }
  0x50   :  { %v496_v13 = vld [vmem:[#allocation7 + $0x40] ss:$8 sps:$4 sm:$0xff]   ;;  %v508_v15 = vld [vmem:[#allocation8 + $0x10] sm:$0xff]   ;;  %v500_v17 = vld [vmem:[#allocation7 + $0x64] ss:$8 sps:$4 sm:$0xff]   ;;  %s673_s29 = smov [#allocation11]  }
  0x51   :  { %v509_v18 = vld [vmem:[#allocation8 + $0x18] sm:$0xff]   ;;  %v502_v19 = vld [vmem:[#allocation7 + $0x60] ss:$8 sps:$4 sm:$0xff]   ;;  %v512_v25 = vld [vmem:[#allocation8 + $0x30] sm:$0xff]   ;;  %v100_v31 = vsub.s32 0, %v99_v30  ;;  %v104_v33 = vsub.s32 1, %v99_v30 }
  0x52   :  { %191 = vmatpush1.bf16.msra.mxu0 %v487_v5  ;;  %452 = vmatpush3.bf16.msra.mxu1 %v507_v12  ;;  %v503_v20 = vld [vmem:[#allocation7 + $0x74] ss:$8 sps:$4 sm:$0xff]   ;;  %v510_v21 = vld [vmem:[#allocation8 + $0x20] sm:$0xff]   ;;  %v505_v22 = vld [vmem:[#allocation7 + $0x70] ss:$8 sps:$4 sm:$0xff]   ;;  %s398_s30 = sshll.u32 %s673_s29, 4  ;;  %s399_s30 = int_to_ptr.vmem [resolvable:$true] %s398_s30 }
  0x53   :  { %192 = vmatprep.subr.bf16.mxu0 %v488_v6  ;;  %453 = vmatprep.subr.bf16.mxu1 %v671_v1  ;;  %v511_v23 = vld [vmem:[#allocation8 + $0x28] sm:$0xff]   ;;  %v79_v24 = vld [vmem:[#allocation2] sm:$0xf]  ;;  %v268_v26 = vld [vmem:[#allocation5] sm:$0xf]  ;;  %s608_s8 = scalar_lea.vmem %s399_s30, 128  ;;  %p613_p5 = scmp.lt.s32.totalorder %s399_s30, %s399_s30 }
  0x54   :  { %v513_v27 = vld [vmem:[#allocation8 + $0x38] sm:$0xff]   ;;  %v269_v28 = vmax.bf16 %v670_v0, %v268_v26  ;;  %p609_p4 = scmp.ne.s32.totalorder %s399_s30, %s608_s8  ;;  %p614_p6 = scmp.lt.s32.totalorder %s608_s8, %s608_s8 }
  0x55   :  { %v96_v32 = vld [vmem:[%s798_s3] sm:$0x3] }
  0x56   :  { %193 = vmatpush1.bf16.msra.mxu0 %v490_v7  ;;  %454 = vmatpush3.bf16.msra.mxu1 %v508_v15  ;;  %v101_v34 = vrot.slane %v96_v32, %v100_v31  ;;  %v105_v35 = vrot.slane %v96_v32, %v104_v33  ;;  %v430_v56 = vld [vmem:[%s800_s5] ss:$0 sm:$0xff]  ;;  %p615_p7 = por %p614_p6, %p613_p5 }
  0x57   :  { %194 = vmatprep.subr.bf16.mxu0 %v491_v8  ;;  %455 = vmatprep.subr.bf16.mxu1 %v671_v1 }
  0x58   :  { %p616_p8 = pnand %p615_p7, %p609_p4 }
  0x5a   :  { %195 = vmatpush1.bf16.msra.mxu0 %v493_v9  ;;  %456 = vmatpush3.bf16.msra.mxu1 %v509_v18 }
  0x5b   :  { %196 = vmatprep.subr.bf16.mxu0 %v494_v10  ;;  %457 = vmatprep.subr.bf16.mxu1 %v671_v1 }
  0x5e   :  { %197 = vmatpush1.bf16.msra.mxu0 %v496_v13  ;;  %458 = vmatpush3.bf16.msra.mxu1 %v510_v21 }
  0x5f   :  { %198 = vmatprep.subr.bf16.mxu0 %v497_v14  ;;  %459 = vmatprep.subr.bf16.mxu1 %v671_v1 }
  0x62   :  { %199 = vmatpush1.bf16.msra.mxu0 %v499_v16  ;;  %460 = vmatpush3.bf16.msra.mxu1 %v511_v23 }
  0x63   :  { %200 = vmatprep.subr.bf16.mxu0 %v500_v17  ;;  %461 = vmatprep.subr.bf16.mxu1 %v671_v1 }
  0x66   :  { %201 = vmatpush1.bf16.msra.mxu0 %v502_v19  ;;  %462 = vmatpush3.bf16.msra.mxu1 %v512_v25 }
  0x67   :  { %202 = vmatprep.subr.bf16.mxu0 %v503_v20  ;;  %463 = vmatprep.subr.bf16.mxu1 %v671_v1 }
  0x6a   :  { %203 = vmatpush1.bf16.msra.mxu0 %v505_v22  ;;  %464 = vmatpush3.bf16.msra.mxu1 %v513_v27 }
  0x6d   :  { %221 = vmatmul.mubr.bf16.vlgmr.msra.gmra.mrb[0].mxu0 %v79_v24  ;;  %466 = vmatmul.mubr.bf16.vlgmr.msra.gmra.mrb[0].mxu1 %v269_v28 }
 0x140   :  { %v222_v36 = vpop.f32.mrb[0].mxu0  ;;  %v375_v57 = vpop.f32.mrb[0].mxu1 }
 0x141   :  { %v223_v37 = vadd.f32 %v222_v36, %v101_v34  ;;  %v224_v38 = vpop.f32.mrb[1].mxu0  ;;  %v376_v58 = vadd.f32 %v430_v56, %v375_v57  ;;  %v467_v59 = vpop.f32.mrb[1].mxu1 }
 0x142   :  { %v225_v39 = vadd.f32 %v224_v38, %v105_v35  ;;  %v226_v40 = vpop.f32.mrb[2].mxu0  ;;  %v378_v60 = vpop.f32.mrb[2].mxu1 }
 0x143   :  { %v231_v41 = vmul.f32 0.70710677, %v223_v37  ;;  %v227_v42 = vpop.f32.mrb[3].mxu0  ;;  %v229_v46 = vmul.f32 0.5, %v223_v37  ;;  %381 = vst [vmem:[#allocation11] sm:$0xff] %v376_v58  ;;  %v468_v61 = vpop.f32.mrb[3].mxu1 }
 0x144   :  { %v232_v43 = vmul.f32 0.70710677, %v225_v39  ;;  %v230_v48 = vmul.f32 0.5, %v225_v39 }
 0x145   :  { %514 = verf.f32 %v231_v41 }
 0x146   :  { %516 = verf.f32 %v232_v43 }
 0x14f   :  { %v515_v44 = vpop.eup %514 }
 0x150   :  { %v517_v45 = vpop.eup %516  ;;  %v235_v47 = vadd.f32 1.0, %v515_v44 }
 0x151   :  { %v236_v49 = vadd.f32 1.0, %v517_v45 }
 0x152   :  { %v237_v50 = vmul.f32 %v235_v47, %v229_v46 }
 0x153   :  { %v238_v51 = vmul.f32 %v236_v49, %v230_v48 }
 0x154   :  { %v244_v53 = vmul.f32 %v237_v50, %v237_v50 }
 0x155   :  { %v239_v52 = vadd.f32 %v238_v51, %v237_v50  ;;  %v245_v54 = vmul.f32 %v238_v51, %v238_v51 }
 0x157   :  { %240 = vadd.xlane.f32.xlu0 %v239_v52  ;;  %v246_v55 = vadd.f32 %v245_v54, %v244_v53 }
 0x15b   :  { %247 = vadd.xlane.f32.xlu0 %v246_v55 }
 0x15c   :  { %619 = shalt.err (!%p616_p8)
}
 0x15d   :  { %s620_s5 = scalar_lea.hbm %s802_s7, 128 }
 0x15e   :  { %p621_p9 = scmp.ne.s32.totalorder %s802_s7, %s620_s5  ;;  %p624_p10 = scmp.lt.u32.totalorder %s620_s5, %s802_s7 }
 0x160   :  { %p626_p11 = pnand %p624_p10, %p621_p9 }
 0x162   :  { %629 = shalt.err (!%p626_p11)
}
 0x163   :  { %401 = dma.vmem_to_hbm [thread:$0]  %s399_s30, 128, %s802_s7, [#allocation12]  }
 0x164   :  { %s674_s15 = smov [#allocation10]  }
 0x165   :  { %s388_s16 = sshll.u32 %s674_s15, 4  ;;  %s389_s16 = int_to_ptr.vmem [resolvable:$true] %s388_s16 }
 0x166   :  { %s630_s7 = scalar_lea.vmem %s389_s16, 128  ;;  %p635_p13 = scmp.lt.s32.totalorder %s389_s16, %s389_s16 }
 0x167   :  { %p631_p12 = scmp.ne.s32.totalorder %s389_s16, %s630_s7  ;;  %p636_p0 = scmp.lt.s32.totalorder %s630_s7, %s630_s7 }
 0x169   :  { %p637_p1 = por %p636_p0, %p635_p13 }
 0x16b   :  { %p638_p2 = pnand %p637_p1, %p631_p12 }
 0x1e4   :  { %v241_v62 = vpop.xlane.xlu0 %240 }
 0x1e5   :  { %v243_v63 = vmul.f32 0.00390625, %v241_v62 }
 0x1e7   :  { %v250_v1 = vmul.f32 %v243_v63, %v243_v63  ;;  %v253_v6 = vsub.f32 %v237_v50, %v243_v63  ;;  %v254_v7 = vsub.f32 %v238_v51, %v243_v63 }
 0x1e8   :  { %v248_v0 = vpop.xlane.xlu0 %247 }
 0x1e9   :  { %v249_v2 = vmul.f32 0.00390625, %v248_v0 }
 0x1eb   :  { %v251_v3 = vsub.f32 %v249_v2, %v250_v1 }
 0x1ed   :  { %v252_v4 = vmax.f32 %v251_v3, 0.0 }
 0x1ef   :  { %v255_v5 = vadd.f32 1e-12, %v252_v4 }
 0x1f1   :  { %518 = vrsqrt.f32 %v255_v5 }
 0x1fb   :  { %v519_v8 = vpop.eup %518 }
 0x1fc   :  { %v257_v9 = vmul.f32 %v519_v8, %v253_v6  ;;  %v258_v10 = vmul.f32 %v519_v8, %v254_v7 }
 0x1fe   :  { %v439_v11 = vpack.c.bf16 %v258_v10, %v257_v9 }
 0x200   :  { %267 = vst [vmem:[#allocation10] sm:$0xff] %v439_v11 }
 0x201   :  { %641 = shalt.err (!%p638_p2)
}
 0x202   :  { %s642_s19 = scalar_lea.hbm %s801_s6, 128 }
 0x203   :  { %p643_p3 = scmp.ne.s32.totalorder %s801_s6, %s642_s19  ;;  %p646_p4 = scmp.lt.u32.totalorder %s642_s19, %s801_s6 }
 0x205   :  { %p648_p5 = pnand %p646_p4, %p643_p3 }
 0x207   :  { %651 = shalt.err (!%p648_p5)
}
 0x208   :  { %391 = dma.vmem_to_hbm [thread:$0]  %s389_s16, 128, %s801_s6, [#allocation4]  }
 0x209   :  { %658 = dma.done.wait [#allocation4], 128  }
 0x20a   :  { %659 = vsyncadd [#allocation4], 4294967168 }
 0x20b   :  { %660 = dma.done.wait [#allocation12], 128  }
 0x20c   :  { %661 = vsyncadd [#allocation12], 4294967168 }
 0x20d   :  { %408 = vsyncpa [#allocation3], 1 }
 0x20e   :  { %409 = vsyncpa [#allocation6], 1 }
 0x20f   :  { %410 = vsyncpa [#allocation9], 1 }
 0x210   :  { %411 = vsyncpa [#allocation4], 1 }
 0x211   :  { %412 = vsyncpa [#allocation12], 1 }

</bundles_post_ra>
